<compile_context>
chip_gen: v5e
topology: v5e:2x2
jax: 0.10.0
libtpu: 0.0.40
codegen_flags: <defaults>
</compile_context>

<pallas_src>
import jax
import jax.numpy as jnp
from jax.experimental import pallas as pl
from jax.experimental.pallas import tpu as pltpu


_LANES = 512          # lane-dense minor dimension (multiple of 128)
_MAX_ROW_TILE = 1024  # up to (1024, 512) f32 = 2 MiB per input block


def _round_up(a, b):
    return -(-a // b) * b


# ----------------------------------------------------------------------------
# Kernel 1: per-tile partial max|x|  (grid axis is fully parallel)
# ----------------------------------------------------------------------------
def _maxabs_kernel(x_ref, m_ref):
    a = jnp.abs(x_ref[...].astype(jnp.float32))                 # (TR, L)
    p = jnp.max(a, axis=0, keepdims=True)                       # (1, L)
    m_ref[...] = jnp.broadcast_to(p, m_ref.shape)               # (8, L) partial


# ----------------------------------------------------------------------------
# Kernel 2: quantize to int8 mantissa (scale comes in as an SMEM scalar)
# ----------------------------------------------------------------------------
def _quant_kernel(scale_ref, x_ref, q_ref):
    s = scale_ref[0]                                            # 2^-exp (SMEM)
    x = x_ref[...].astype(jnp.float32)
    q = jnp.clip(jnp.round(x * s), -127.0, 127.0)
    q_ref[...] = q.astype(jnp.int8)


# ----------------------------------------------------------------------------
# Wrapper: TiNet.forward
# ----------------------------------------------------------------------------
def ti_net_forward(x_nchw):
    """Returns (out_data_int8_NHWC, out_exp, out_bits)."""
    N, C, H, W = x_nchw.shape
    T = N * C * H * W
    in_dtype = x_nchw.dtype

    # Lane-dense 2-D slab: (rows, 512); row tile is a multiple of 32 so the
    # int8 output tiles are unmasked.
    L = _LANES
    R = pl.cdiv(T, L)
    TR = min(_MAX_ROW_TILE, _round_up(R, 32))
    Rp = _round_up(R, TR)
    num_tiles = Rp // TR
    pad = Rp * L - T

    flat = x_nchw.reshape(-1)
    if pad:
        flat = jnp.pad(flat, (0, pad))          # zeros: harmless for max / quant
    x2d = flat.reshape(Rp, L)

    cparams = pltpu.CompilerParams(
        dimension_semantics=("parallel",),
        vmem_limit_bytes=32 * 1024 * 1024,
    )

    # -- pass 1: per-tile partial max-abs, tiny final reduce in XLA ----------
    partial = pl.pallas_call(
        _maxabs_kernel,
        out_shape=jax.ShapeDtypeStruct((num_tiles * 8, L), jnp.float32),
        grid=(num_tiles,),
        in_specs=[pl.BlockSpec((TR, L), lambda i: (i, 0))],
        out_specs=pl.BlockSpec((8, L), lambda i: (i, 0)),
        compiler_params=cparams,
    )(x2d)

    max_abs = jnp.max(partial)
    max_abs_safe = jnp.maximum(max_abs, jnp.float32(jnp.finfo(jnp.float32).tiny))

    # scalar glue: shared exponent and scale
    exp = jnp.ceil(jnp.log2(max_abs_safe)) - 7.0
    scale = jnp.exp2(-exp).astype(jnp.float32)

    # -- pass 2: quantize (no accumulator -> fully parallel) -----------------
    q2d = pl.pallas_call(
        _quant_kernel,
        out_shape=jax.ShapeDtypeStruct((Rp, L), jnp.int8),
        grid=(num_tiles,),
        in_specs=[
            pl.BlockSpec(memory_space=pltpu.MemorySpace.SMEM),   # scale (1,)
            pl.BlockSpec((TR, L), lambda i: (i, 0)),             # x tile
        ],
        out_specs=pl.BlockSpec((TR, L), lambda i: (i, 0)),
        compiler_params=cparams,
    )(scale.reshape(1), x2d)

    # NCHW int8 -> NHWC permute (4x cheaper than permuting the f32 input).
    q_nchw = q2d.reshape(-1)[:T].reshape(N, C, H, W)
    out_data = jnp.transpose(q_nchw, (0, 2, 3, 1))

    # RangeEstimate, computed analytically from max|x| (exact: |round| is
    # symmetric and monotone, so max|q| == min(round(max|x| * scale), 127)).
    maxint = jnp.where(
        max_abs > 0.0,
        jnp.minimum(jnp.round(max_abs_safe * scale), 127.0),
        0.0,
    )
    out_bits = jnp.ceil(jnp.log2(jnp.maximum(maxint, 1.0)))

    out_exp = exp
    return out_data, out_exp, out_bits


# ----------------------------------------------------------------------------
# Pure-JAX reference (same TiFloatToInt8 / RangeEstimate convention)
# ----------------------------------------------------------------------------
def ti_net_forward_ref(x_nchw):
    x = x_nchw.astype(jnp.float32)
    max_abs = jnp.max(jnp.abs(x))
    max_abs_safe = jnp.maximum(max_abs, jnp.float32(jnp.finfo(jnp.float32).tiny))
    exp = jnp.ceil(jnp.log2(max_abs_safe)) - 7.0
    scale = jnp.exp2(-exp)
    q = jnp.clip(jnp.round(x * scale), -127.0, 127.0).astype(jnp.int8)
    q_nhwc = jnp.transpose(q, (0, 2, 3, 1))
    maxint = jnp.max(jnp.abs(q_nhwc.astype(jnp.float32)))
    bits = jnp.ceil(jnp.log2(jnp.maximum(maxint, 1.0)))
    return q_nhwc, exp, bits


if __name__ == "__main__":
    key = jax.random.PRNGKey(0)
    fwd = jax.jit(ti_net_forward)
    ref = jax.jit(ti_net_forward_ref)

    # (a) the module's small test shape; (b) a larger ragged shape that
    # exercises multi-tile grid + padding.
    for shape in [(2, 4, 16, 16), (2, 16, 181, 181)]:
        key, sub = jax.random.split(key)
        x = jax.random.normal(sub, shape, dtype=jnp.float32)  # NCHW

        out_data, out_exp, out_bits = fwd(x)
        jax.block_until_ready((out_data, out_exp, out_bits))
        r_data, r_exp, r_bits = ref(x)

        N, C, H, W = shape
        assert out_data.shape == (N, H, W, C) and out_data.dtype == jnp.int8
        assert out_exp.shape == () and out_bits.shape == ()

        qdiff = int(jnp.max(jnp.abs(out_data.astype(jnp.int32)
                                    - r_data.astype(jnp.int32))))
        assert qdiff <= 1, f"quantized data mismatch (max diff {qdiff})"
        assert float(out_exp) == float(r_exp), "exponent mismatch"
        assert float(out_bits) == float(r_bits), "range-estimate mismatch"

    print("KERNEL_OK")
</pallas_src>

<mosaic_0001>
module attributes {stable_mosaic.version = 11 : i64} {
  func.func @_maxabs_kernel(%arg0: i32, %arg1: memref<32x512xf32, #tpu.memory_space<vmem>>, %arg2: memref<8x512xf32, #tpu.memory_space<vmem>>) attributes {dimension_semantics = [#tpu.dimension_semantics<parallel>], iteration_bounds = array<i64: 1>, scalar_prefetch = 0 : i64, scratch_operands = 0 : i64, tpu.core_type = #tpu.core_type<tc>, window_params = [{transform_indices = @transform_0, window_bounds = array<i64: 32, 512>}, {transform_indices = @transform_1, window_bounds = array<i64: 8, 512>}]} {
    %c0 = arith.constant 0 : index
    %c0_0 = arith.constant 0 : index
    %0 = vector.load %arg1[%c0, %c0_0] : memref<32x512xf32, #tpu.memory_space<vmem>>, vector<32x512xf32>
    %1 = math.absf %0 : vector<32x512xf32>
    %cst = arith.constant dense<0xFF800000> : vector<512xf32>
    %2 = vector.multi_reduction <maximumf>, %1, %cst [0] : vector<32x512xf32> to vector<512xf32>
    %3 = vector.shape_cast %2 : vector<512xf32> to vector<1x512xf32>
    %4 = vector.shape_cast %3 : vector<1x512xf32> to vector<1x512xf32>
    %5 = vector.broadcast %4 : vector<1x512xf32> to vector<8x512xf32>
    %c0_1 = arith.constant 0 : index
    %c0_2 = arith.constant 0 : index
    %6 = vector.load %arg2[%c0_1, %c0_2] : memref<8x512xf32, #tpu.memory_space<vmem>>, vector<8x512xf32>
    tpu.vector_store %arg2[%c0_1, %c0_2], %5 {strides = array<i32>} : memref<8x512xf32, #tpu.memory_space<vmem>>, vector<8x512xf32>,
    return
  }
  func.func @transform_0(%arg0: i32) -> (i32, i32) {
    %c0_i32 = arith.constant 0 : i32
    %c0_i32_0 = arith.constant 0 : i32
    return %arg0, %c0_i32 : i32, i32
  }
  func.func @transform_1(%arg0: i32) -> (i32, i32) {
    %c0_i32 = arith.constant 0 : i32
    %c0_i32_0 = arith.constant 0 : i32
    return %arg0, %c0_i32 : i32, i32
  }
}

module attributes {stable_mosaic.version = 11 : i64} {
  func.func @_quant_kernel(%arg0: i32, %arg1: memref<1xf32, #tpu.memory_space<smem>>, %arg2: memref<32x512xf32, #tpu.memory_space<vmem>>, %arg3: memref<32x512xi8, #tpu.memory_space<vmem>>) attributes {dimension_semantics = [#tpu.dimension_semantics<parallel>], iteration_bounds = array<i64: 1>, scalar_prefetch = 0 : i64, scratch_operands = 0 : i64, tpu.core_type = #tpu.core_type<tc>, window_params = [{transform_indices = @transform_0, window_bounds = array<i64: 1>}, {transform_indices = @transform_1, window_bounds = array<i64: 32, 512>}, {transform_indices = @transform_2, window_bounds = array<i64: 32, 512>}]} {
    %c0 = arith.constant 0 : index
    %0 = memref.load %arg1[%c0] : memref<1xf32, #tpu.memory_space<smem>>
    %c0_0 = arith.constant 0 : index
    %c0_1 = arith.constant 0 : index
    %1 = vector.load %arg2[%c0_0, %c0_1] : memref<32x512xf32, #tpu.memory_space<vmem>>, vector<32x512xf32>
    %2 = vector.broadcast %0 : f32 to vector<32x512xf32>
    %3 = arith.mulf %1, %2 : vector<32x512xf32>
    %4 = math.roundeven %3 : vector<32x512xf32>
    %cst = arith.constant -1.270000e+02 : f32
    %cst_2 = arith.constant 1.270000e+02 : f32
    %5 = vector.broadcast %cst : f32 to vector<32x512xf32>
    %6 = arith.maximumf %5, %4 : vector<32x512xf32>
    %7 = vector.broadcast %cst_2 : f32 to vector<32x512xf32>
    %8 = arith.minimumf %7, %6 : vector<32x512xf32>
    %9 = arith.fptosi %8 : vector<32x512xf32> to vector<32x512xi8>
    %c0_3 = arith.constant 0 : index
    %c0_4 = arith.constant 0 : index
    %10 = vector.load %arg3[%c0_3, %c0_4] : memref<32x512xi8, #tpu.memory_space<vmem>>, vector<32x512xi8>
    tpu.vector_store %arg3[%c0_3, %c0_4], %9 {strides = array<i32>} : memref<32x512xi8, #tpu.memory_space<vmem>>, vector<32x512xi8>,
    return
  }
  func.func @transform_0(%arg0: i32) -> i32 {
    %c0_i32 = arith.constant 0 : i32
    %c0_i32_0 = arith.constant 0 : i32
    return %c0_i32 : i32
  }
  func.func @transform_1(%arg0: i32) -> (i32, i32) {
    %c0_i32 = arith.constant 0 : i32
    %c0_i32_0 = arith.constant 0 : i32
    return %arg0, %c0_i32 : i32, i32
  }
  func.func @transform_2(%arg0: i32) -> (i32, i32) {
    %c0_i32 = arith.constant 0 : i32
    %c0_i32_0 = arith.constant 0 : i32
    return %arg0, %c0_i32 : i32, i32
  }
}

</mosaic_0001>

<bundles_post_ra>
// kernel: ti_net_forward.2
= control target key start
LH: loop header
LB: loop body
LE: loop exit
PB: predicated region body
PF: predicated region fallthrough
CT: control target
= control target key end

     0   :  { %s154_s0 = inlined_call_operand.vmem [shape: f32[32,512], index: 0, kind: input, shape index: {}]   ;;  %s155_s1 = inlined_call_operand.vmem [shape: f32[8,512], index: 1, kind: output, shape index: {}]  }
   0x1   :  { %v8_v0 = vld [vmem:[%s154_s0] sm:$0xff]  ;;  %v9_v6 = vld [vmem:[%s154_s0 + $0x8] sm:$0xff]  ;;  %v10_v15 = vld [vmem:[%s154_s0 + $0x10] sm:$0xff] }
   0x2   :  { %v12_v1 = vld [vmem:[%s154_s0 + $0x20] sm:$0xff]  ;;  %v24_v4 = vand.u32 2147483647, %v8_v0  ;;  %v13_v9 = vld [vmem:[%s154_s0 + $0x28] sm:$0xff]  ;;  %v25_v13 = vand.u32 2147483647, %v9_v6 }
   0x3   :  { %v16_v2 = vld [vmem:[%s154_s0 + $0x40] sm:$0xff]  ;;  %v28_v5 = vand.u32 2147483647, %v12_v1  ;;  %v17_v10 = vld [vmem:[%s154_s0 + $0x48] sm:$0xff]  ;;  %v29_v14 = vand.u32 2147483647, %v13_v9 }
   0x4   :  { %v20_v3 = vld [vmem:[%s154_s0 + $0x60] sm:$0xff]  ;;  %v32_v7 = vand.u32 2147483647, %v16_v2  ;;  %v21_v12 = vld [vmem:[%s154_s0 + $0x68] sm:$0xff]  ;;  %v33_v16 = vand.u32 2147483647, %v17_v10 }
   0x5   :  { %v36_v8 = vand.u32 2147483647, %v20_v3  ;;  %v40_v11 = vmax.f32 %v24_v4, %v28_v5  ;;  %v37_v17 = vand.u32 2147483647, %v21_v12  ;;  %v14_v18 = vld [vmem:[%s154_s0 + $0x30] sm:$0xff]  ;;  %v49_v21 = vmax.f32 %v25_v13, %v29_v14  ;;  %v11_v25 = vld [vmem:[%s154_s0 + $0x18] sm:$0xff] }
   0x6   :  { %v18_v19 = vld [vmem:[%s154_s0 + $0x50] sm:$0xff]  ;;  %v26_v23 = vand.u32 2147483647, %v10_v15  ;;  %v30_v24 = vand.u32 2147483647, %v14_v18  ;;  %v15_v28 = vld [vmem:[%s154_s0 + $0x38] sm:$0xff] }
   0x7   :  { %v41_v20 = vmax.f32 %v40_v11, %v32_v7  ;;  %v22_v22 = vld [vmem:[%s154_s0 + $0x70] sm:$0xff]  ;;  %v34_v26 = vand.u32 2147483647, %v18_v19  ;;  %v19_v29 = vld [vmem:[%s154_s0 + $0x58] sm:$0xff]  ;;  %v50_v31 = vmax.f32 %v49_v21, %v33_v16  ;;  %v27_v34 = vand.u32 2147483647, %v11_v25 }
   0x8   :  { %v38_v27 = vand.u32 2147483647, %v22_v22  ;;  %v58_v32 = vmax.f32 %v26_v23, %v30_v24  ;;  %v23_v33 = vld [vmem:[%s154_s0 + $0x78] sm:$0xff]  ;;  %v31_v35 = vand.u32 2147483647, %v15_v28 }
   0x9   :  { %v42_v30 = vmax.f32 %v41_v20, %v36_v8  ;;  %v35_v36 = vand.u32 2147483647, %v19_v29  ;;  %v51_v38 = vmax.f32 %v50_v31, %v37_v17  ;;  %v39_v40 = vand.u32 2147483647, %v23_v33 }
   0xa   :  { %v59_v39 = vmax.f32 %v58_v32, %v34_v26  ;;  %v67_v41 = vmax.f32 %v27_v34, %v31_v35 }
   0xb   :  { %v43_v37 = vrot.slane %v42_v30, 4  ;;  %v52_v43 = vrot.slane %v51_v38, 4 }
   0xc   :  { %v60_v44 = vmax.f32 %v59_v39, %v38_v27  ;;  %v68_v45 = vmax.f32 %v67_v41, %v35_v36 }
   0xd   :  { %v44_v42 = vmax.f32 %v42_v30, %v43_v37  ;;  %v53_v47 = vmax.f32 %v51_v38, %v52_v43 }
   0xe   :  { %v61_v48 = vrot.slane %v60_v44, 4  ;;  %v69_v49 = vmax.f32 %v68_v45, %v39_v40 }
   0xf   :  { %v45_v46 = vrot.slane %v44_v42, 2  ;;  %v54_v51 = vrot.slane %v53_v47, 2 }
  0x10   :  { %v62_v52 = vmax.f32 %v60_v44, %v61_v48  ;;  %v70_v53 = vrot.slane %v69_v49, 4 }
  0x11   :  { %v46_v50 = vmax.f32 %v44_v42, %v45_v46  ;;  %v55_v55 = vmax.f32 %v53_v47, %v54_v51 }
  0x12   :  { %v63_v56 = vrot.slane %v62_v52, 2  ;;  %v71_v57 = vmax.f32 %v69_v49, %v70_v53 }
  0x13   :  { %v47_v54 = vrot.slane %v46_v50, 1  ;;  %v56_v59 = vrot.slane %v55_v55, 1 }
  0x14   :  { %v64_v60 = vmax.f32 %v62_v52, %v63_v56  ;;  %v72_v61 = vrot.slane %v71_v57, 2 }
  0x15   :  { %v48_v58 = vmax.f32 %v46_v50, %v47_v54  ;;  %v57_v62 = vmax.f32 %v55_v55, %v56_v59 }
  0x16   :  { %v65_v63 = vrot.slane %v64_v60, 1  ;;  %v73_v0 = vmax.f32 %v71_v57, %v72_v61 }
  0x17   :  { %76 = vst [vmem:[%s155_s1] sm:$0xff] %v48_v58 }
  0x18   :  { %77 = vst [vmem:[%s155_s1 + $0x8] sm:$0xff] %v57_v62  ;;  %v66_v1 = vmax.f32 %v64_v60, %v65_v63  ;;  %v74_v2 = vrot.slane %v73_v0, 1 }
  0x1a   :  { %78 = vst [vmem:[%s155_s1 + $0x10] sm:$0xff] %v66_v1  ;;  %v75_v3 = vmax.f32 %v73_v0, %v74_v2 }
  0x1c   :  { %79 = vst [vmem:[%s155_s1 + $0x18] sm:$0xff] %v75_v3 }

// kernel: ti_net_forward.3
= control target key start
LH: loop header
LB: loop body
LE: loop exit
PB: predicated region body
PF: predicated region fallthrough
CT: control target
= control target key end

     0   :  { %s336_s0 = inlined_call_operand.<no memory space> [shape: f32[1], index: 0, kind: input, shape index: {}]   ;;  %s337_s1 = inlined_call_operand.vmem [shape: f32[32,512], index: 1, kind: input, shape index: {}]   ;;  %s338_s2 = inlined_call_operand.vmem [shape: s8[32,512], index: 2, kind: output, shape index: {}]  }
   0x1   :  { %v13_v0 = vld [vmem:[%s337_s1] sm:$0xff]  ;;  %v14_v1 = vld [vmem:[%s337_s1 + $0x8] sm:$0xff]  ;;  %v15_v2 = vld [vmem:[%s337_s1 + $0x10] sm:$0xff]  ;;  %v29_v3 = vstv %s336_s0 }
   0x2   :  { %v16_v4 = vld [vmem:[%s337_s1 + $0x18] sm:$0xff]  ;;  %v30_v5 = vmul.f32 %v29_v3, %v13_v0  ;;  %v31_v6 = vmul.f32 %v29_v3, %v14_v1  ;;  %v32_v7 = vmul.f32 %v29_v3, %v15_v2  ;;  %v17_v8 = vld [vmem:[%s337_s1 + $0x20] sm:$0xff]  ;;  %v18_v9 = vld [vmem:[%s337_s1 + $0x28] sm:$0xff] }
   0x3   :  { %v33_v10 = vmul.f32 %v29_v3, %v16_v4  ;;  %v19_v11 = vld [vmem:[%s337_s1 + $0x30] sm:$0xff]  ;;  %v20_v12 = vld [vmem:[%s337_s1 + $0x38] sm:$0xff]  ;;  %v34_v13 = vmul.f32 %v29_v3, %v17_v8  ;;  %v35_v14 = vmul.f32 %v29_v3, %v18_v9  ;;  %v21_v23 = vld [vmem:[%s337_s1 + $0x40] sm:$0xff] }
   0x4   :  { %v178_v15 = vclamps-f32 %v30_v5, 127.0  ;;  %v180_v16 = vclamps-f32 %v31_v6, 127.0  ;;  %v182_v17 = vclamps-f32 %v32_v7, 127.0  ;;  %v36_v18 = vmul.f32 %v29_v3, %v19_v11  ;;  %v22_v24 = vld [vmem:[%s337_s1 + $0x48] sm:$0xff]  ;;  %v23_v29 = vld [vmem:[%s337_s1 + $0x50] sm:$0xff]  ;;  %v24_v34 = vld [vmem:[%s337_s1 + $0x58] sm:$0xff] }
   0x5   :  { %v184_v19 = vclamps-f32 %v33_v10, 127.0  ;;  %v37_v20 = vmul.f32 %v29_v3, %v20_v12  ;;  %v186_v21 = vclamps-f32 %v34_v13, 127.0  ;;  %v188_v22 = vclamps-f32 %v35_v14, 127.0  ;;  %v25_v35 = vld [vmem:[%s337_s1 + $0x60] sm:$0xff]  ;;  %v26_v40 = vld [vmem:[%s337_s1 + $0x68] sm:$0xff]  ;;  %v27_v45 = vld [vmem:[%s337_s1 + $0x70] sm:$0xff] }
   0x6   :  { %v212_v25 = vcvt.f32.s32 %v178_v15  ;;  %v215_v26 = vcvt.f32.s32 %v180_v16  ;;  %v218_v27 = vcvt.f32.s32 %v182_v17  ;;  %v190_v28 = vclamps-f32 %v36_v18, 127.0  ;;  %v28_v49 = vld [vmem:[%s337_s1 + $0x78] sm:$0xff] }
   0x7   :  { %v221_v30 = vcvt.f32.s32 %v184_v19  ;;  %v224_v31 = vcvt.f32.s32 %v186_v21  ;;  %v227_v32 = vcvt.f32.s32 %v188_v22  ;;  %v192_v33 = vclamps-f32 %v37_v20, 127.0 }
   0x8   :  { %v142_v36 = vpack.c.b16 %v215_v26, %v212_v25  ;;  %v230_v37 = vcvt.f32.s32 %v190_v28  ;;  %v38_v38 = vmul.f32 %v29_v3, %v21_v23  ;;  %v39_v39 = vmul.f32 %v29_v3, %v22_v24 }
   0x9   :  { %v143_v41 = vpack.c.b16 %v221_v30, %v218_v27  ;;  %v233_v42 = vcvt.f32.s32 %v192_v33  ;;  %v145_v43 = vpack.c.b16 %v227_v32, %v224_v31  ;;  %v40_v44 = vmul.f32 %v29_v3, %v23_v29 }
   0xa   :  { %v41_v46 = vmul.f32 %v29_v3, %v24_v34  ;;  %v194_v47 = vclamps-f32 %v38_v38, 127.0  ;;  %v196_v48 = vclamps-f32 %v39_v39, 127.0  ;;  %v42_v50 = vmul.f32 %v29_v3, %v25_v35 }
   0xb   :  { %v144_v51 = vpack.c.b8 %v143_v41, %v142_v36  ;;  %v146_v52 = vpack.c.b16 %v233_v42, %v230_v37  ;;  %v198_v53 = vclamps-f32 %v40_v44, 127.0  ;;  %v43_v54 = vmul.f32 %v29_v3, %v26_v40 }
   0xc   :  { %v236_v55 = vcvt.f32.s32 %v194_v47  ;;  %v239_v56 = vcvt.f32.s32 %v196_v48  ;;  %v200_v57 = vclamps-f32 %v41_v46, 127.0  ;;  %v44_v58 = vmul.f32 %v29_v3, %v27_v45 }
   0xd   :  { %154 = vst [vmem:[%s338_s2] sm:$0xff] %v144_v51  ;;  %v147_v59 = vpack.c.b8 %v146_v52, %v145_v43  ;;  %v242_v60 = vcvt.f32.s32 %v198_v53  ;;  %v45_v61 = vmul.f32 %v29_v3, %v28_v49  ;;  %v202_v62 = vclamps-f32 %v42_v50, 127.0 }
   0xe   :  { %v245_v63 = vcvt.f32.s32 %v200_v57  ;;  %v148_v0 = vpack.c.b16 %v239_v56, %v236_v55  ;;  %v204_v1 = vclamps-f32 %v43_v54, 127.0  ;;  %v206_v2 = vclamps-f32 %v44_v58, 127.0 }
   0xf   :  { %155 = vst [vmem:[%s338_s2 + $0x8] sm:$0xff] %v147_v59  ;;  %v248_v4 = vcvt.f32.s32 %v202_v62  ;;  %v208_v5 = vclamps-f32 %v45_v61, 127.0 }
  0x10   :  { %v149_v6 = vpack.c.b16 %v245_v63, %v242_v60  ;;  %v251_v7 = vcvt.f32.s32 %v204_v1  ;;  %v254_v8 = vcvt.f32.s32 %v206_v2 }
  0x11   :  { %v257_v9 = vcvt.f32.s32 %v208_v5 }
  0x12   :  { %v150_v10 = vpack.c.b8 %v149_v6, %v148_v0  ;;  %v151_v11 = vpack.c.b16 %v251_v7, %v248_v4 }
  0x13   :  { %v152_v12 = vpack.c.b16 %v257_v9, %v254_v8 }
  0x14   :  { %156 = vst [vmem:[%s338_s2 + $0x10] sm:$0xff] %v150_v10 }
  0x15   :  { %v153_v3 = vpack.c.b8 %v152_v12, %v151_v11 }
  0x17   :  { %157 = vst [vmem:[%s338_s2 + $0x18] sm:$0xff] %v153_v3 }

</bundles_post_ra>
